<compile_context>
chip_gen: v5e
topology: v5e:2x2
jax: 0.10.0
libtpu: 0.0.40
codegen_flags: <defaults>
</compile_context>

<pallas_src>
import jax
import jax.numpy as jnp
from jax import lax
from jax.experimental import pallas as pl
from jax.experimental.pallas import tpu as pltpu


def _round_up(x, m):
    return ((x + m - 1) // m) * m


# ----------------------------------------------------------------------------- kernel
def mlp_kernel(x_ref, w_ref, b_ref, o_ref):
    # Single fused affine layer: bf16 MXU inputs (cast in-kernel), f32
    # accumulation, f32 bias add, single cast on the final store.
    x = x_ref[...].astype(jnp.bfloat16)
    acc = jnp.dot(x, w_ref[...], preferred_element_type=jnp.float32)
    o_ref[...] = (acc + b_ref[...]).astype(o_ref.dtype)


# ----------------------------------------------------------------------------- params
def prepare_params(params):
    """One-time repack OUTSIDE the hot path.

    Collapse the 4 linears (valid because the module has no nonlinearity):
        y = x @ (W1^T W2^T W3^T W4^T) + (((b1 W2^T + b2) W3^T + b3) W4^T + b4)
    done in f32 with HIGHEST precision, then cast W_eff to bf16 once for the
    MXU.  Class dim is zero-padded lane-dense (128, or 256 for large class
    counts to fill the 2x256 MXU on v6e/v7x).  Bias stays f32.
    """
    hi = lax.Precision.HIGHEST
    w_eff = params["w1"].astype(jnp.float32).T          # (d_in, hidden)
    b_eff = params["b1"].astype(jnp.float32)
    for wk, bk in (("w2", "b2"), ("w3", "b3"), ("w4", "b4")):
        wt = params[wk].astype(jnp.float32).T            # (in, out)
        b_eff = jnp.dot(b_eff, wt, precision=hi) + params[bk].astype(jnp.float32)
        w_eff = jnp.dot(w_eff, wt, precision=hi)

    d_in, classes = w_eff.shape
    pad_gran = 256 if classes >= 256 else 128            # MXU-fill for big dims
    c_pad = _round_up(classes, pad_gran)

    w_eff = jnp.pad(w_eff, ((0, 0), (0, c_pad - classes))).astype(jnp.bfloat16)
    b_eff = jnp.pad(b_eff, (0, c_pad - classes))[None, :].astype(jnp.float32)
    return {"w": w_eff, "b": b_eff, "dims": (d_in, classes, c_pad)}


# ----------------------------------------------------------------------------- forward
def mlp_forward(x, prepared, *, tile_m=1024):
    """x: (B, 1, image_size, image_size) float32; prepared: prepare_params(...)."""
    d_in, classes, c_pad = prepared["dims"]
    w_eff, b_eff = prepared["w"], prepared["b"]

    # matches torch.reshape(x, (-1, image_size*image_size)); stays f32 here,
    # bf16 cast happens inside the kernel (halves x HBM traffic).
    x2d = x.reshape(-1, d_in).astype(jnp.float32)
    rows = x2d.shape[0]

    # Batch tile: multiple of 16 (bf16 packs 16 rows / vreg).
    tm = min(tile_m, _round_up(rows, 16))
    tm = max(16, _round_up(tm, 16))

    # VMEM budget from the actual chip (v7x 64 MiB, v5e/v6e 128 MiB), ~75%.
    try:
        vmem_cap = int(getattr(pltpu.get_tpu_info(), "vmem_capacity_bytes",
                               64 * 1024 * 1024))
    except Exception:
        vmem_cap = 64 * 1024 * 1024
    budget = int(vmem_cap * 0.75)

    param_bytes = (w_eff.size * w_eff.dtype.itemsize
                   + b_eff.size * b_eff.dtype.itemsize)

    def vmem_est(tm_):
        return (2 * tm_ * d_in * 4          # f32 x tiles, double-buffered
                + 2 * tm_ * c_pad * 4       # f32 out tiles, double-buffered
                + param_bytes               # params (single-buffered)
                + 2 * tm_ * max(d_in, c_pad) * 4)   # bf16 cast / acc headroom

    # Shrink the tile to fit the budget (never clamp the limit below the need).
    while tm > 16 and vmem_est(tm) > budget:
        tm = max(16, _round_up(tm // 2, 16))

    rows_pad = _round_up(rows, tm)
    # >=2 grid steps when rows allow -> "parallel" axis shards across the two
    # TensorCores of a v7x chip.
    while rows_pad // tm < 2 and tm > 16:
        tm = max(16, _round_up(tm // 2, 16))
        rows_pad = _round_up(rows, tm)

    if rows_pad > rows:
        x2d = jnp.pad(x2d, ((0, rows_pad - rows), (0, 0)))
    grid = (rows_pad // tm,)

    vmem_limit = min(budget, max(vmem_est(tm) + (4 << 20), 32 * 1024 * 1024))

    def _const_spec(arr, single_buffer):
        idx = lambda i: (0,) * arr.ndim
        if single_buffer:
            # Constant index_map never re-fetches; single-buffering halves the
            # resident param footprint.
            return pl.BlockSpec(arr.shape, idx, pipeline_mode=pl.Buffered(1))
        return pl.BlockSpec(arr.shape, idx)

    def _build(single_buffer_params):
        return pl.pallas_call(
            mlp_kernel,
            out_shape=jax.ShapeDtypeStruct((rows_pad, c_pad), jnp.float32),
            grid=grid,
            in_specs=[
                pl.BlockSpec((tm, d_in), lambda i: (i, 0)),
                _const_spec(w_eff, single_buffer_params),
                _const_spec(b_eff, single_buffer_params),
            ],
            out_specs=pl.BlockSpec((tm, c_pad), lambda i: (i, 0)),
            compiler_params=pltpu.CompilerParams(
                dimension_semantics=("parallel",),
                vmem_limit_bytes=vmem_limit,
            ),
        )

    try:
        out = _build(True)(x2d, w_eff, b_eff)
    except Exception:
        # Fallback if pipeline_mode=pl.Buffered(1) is rejected by this
        # jax/libtpu version; default double-buffered params are still tiny
        # after the offline layer collapse.
        out = _build(False)(x2d, w_eff, b_eff)

    # Slice away the batch / class padding.
    return out[:rows, :classes]


# ----------------------------------------------------------------------------- init / ref
def init_params(key, image_size, hidden_size, num_classes):
    d_in = image_size * image_size
    ks = jax.random.split(key, 8)

    def linear_init(kw, kb, fan_in, fan_out):
        # mimics torch.nn.Linear default init (uniform +/- 1/sqrt(fan_in))
        bound = 1.0 / jnp.sqrt(fan_in)
        w = jax.random.uniform(kw, (fan_out, fan_in), jnp.float32, -bound, bound)
        b = jax.random.uniform(kb, (fan_out,), jnp.float32, -bound, bound)
        return w, b

    w1, b1 = linear_init(ks[0], ks[1], d_in, hidden_size)
    w2, b2 = linear_init(ks[2], ks[3], hidden_size, hidden_size)
    w3, b3 = linear_init(ks[4], ks[5], hidden_size, hidden_size)
    w4, b4 = linear_init(ks[6], ks[7], hidden_size, num_classes)
    return {"w1": w1, "b1": b1, "w2": w2, "b2": b2,
            "w3": w3, "b3": b3, "w4": w4, "b4": b4}


def mlp_reference(x, params):
    d_in = x.shape[-1] * x.shape[-2]
    h = x.reshape(-1, d_in)
    h = h @ params["w1"].T + params["b1"]
    h = h @ params["w2"].T + params["b2"]
    h = h @ params["w3"].T + params["b3"]
    h = h @ params["w4"].T + params["b4"]
    return h


if __name__ == "__main__":
    image_size = 16
    hidden_size = 32
    num_classes = 10
    batch = 2

    key = jax.random.PRNGKey(0)
    kx, kp = jax.random.split(key)
    x = jax.random.normal(kx, (batch, 1, image_size, image_size), jnp.float32)
    params = init_params(kp, image_size, hidden_size, num_classes)

    prepared = prepare_params(params)      # one-time repack, outside hot path
    out = mlp_forward(x, prepared)
    out = jax.block_until_ready(out)

    ref = mlp_reference(x, params)
    assert out.shape == (batch, num_classes)
    # bf16 MXU inputs (single rounding of the collapsed weights) vs f32 ref.
    assert jnp.allclose(out, ref, atol=3e-2, rtol=3e-2)
    print("KERNEL_OK")
</pallas_src>

<mosaic_0001>
module attributes {stable_mosaic.version = 11 : i64} {
  func.func @mlp_kernel(%arg0: i32, %arg1: memref<16x256xf32, #tpu.memory_space<vmem>>, %arg2: memref<256x128xbf16, #tpu.memory_space<vmem>>, %arg3: memref<1x128xf32, #tpu.memory_space<vmem>>, %arg4: memref<16x128xf32, #tpu.memory_space<vmem>>) attributes {dimension_semantics = [#tpu.dimension_semantics<parallel>], iteration_bounds = array<i64: 1>, scalar_prefetch = 0 : i64, scratch_operands = 0 : i64, tpu.core_type = #tpu.core_type<tc>, window_params = [{transform_indices = @transform_0, window_bounds = array<i64: 16, 256>}, {pipeline_mode = #tpu.pipeline_mode<synchronous>, transform_indices = @transform_1, window_bounds = array<i64: 256, 128>}, {pipeline_mode = #tpu.pipeline_mode<synchronous>, transform_indices = @transform_2, window_bounds = array<i64: 1, 128>}, {transform_indices = @transform_3, window_bounds = array<i64: 16, 128>}]} {
    %c0 = arith.constant 0 : index
    %c0_0 = arith.constant 0 : index
    %0 = vector.load %arg1[%c0, %c0_0] : memref<16x256xf32, #tpu.memory_space<vmem>>, vector<16x256xf32>
    %1 = arith.truncf %0 : vector<16x256xf32> to vector<16x256xbf16>
    %c0_1 = arith.constant 0 : index
    %c0_2 = arith.constant 0 : index
    %2 = vector.load %arg2[%c0_1, %c0_2] : memref<256x128xbf16, #tpu.memory_space<vmem>>, vector<256x128xbf16>
    %cst = arith.constant dense<0.000000e+00> : vector<16x128xf32>
    %3 = tpu.matmul %1, %2, %cst {dimension_numbers = #tpu.dot_dimension_numbers<[1], [0], [0], [1], [0, 0, 1, 1], [], []>} : vector<16x256xbf16>, vector<256x128xbf16>, vector<16x128xf32> -> vector<16x128xf32>
    %c0_3 = arith.constant 0 : index
    %c0_4 = arith.constant 0 : index
    %4 = vector.load %arg3[%c0_3, %c0_4] : memref<1x128xf32, #tpu.memory_space<vmem>>, vector<1x128xf32>
    %5 = vector.broadcast %4 : vector<1x128xf32> to vector<16x128xf32>
    %6 = arith.addf %3, %5 : vector<16x128xf32>
    %c0_5 = arith.constant 0 : index
    %c0_6 = arith.constant 0 : index
    %7 = vector.load %arg4[%c0_5, %c0_6] : memref<16x128xf32, #tpu.memory_space<vmem>>, vector<16x128xf32>
    tpu.vector_store %arg4[%c0_5, %c0_6], %6 {strides = array<i32>} : memref<16x128xf32, #tpu.memory_space<vmem>>, vector<16x128xf32>,
    return
  }
  func.func @transform_0(%arg0: i32) -> (i32, i32) {
    %c0_i32 = arith.constant 0 : i32
    %c0_i32_0 = arith.constant 0 : i32
    return %arg0, %c0_i32 : i32, i32
  }
  func.func @transform_1(%arg0: i32) -> (i32, i32) {
    %c0_i32 = arith.constant 0 : i32
    %c0_i32_0 = arith.constant 0 : i32
    %c0_i32_1 = arith.constant 0 : i32
    return %c0_i32, %c0_i32_0 : i32, i32
  }
  func.func @transform_2(%arg0: i32) -> (i32, i32) {
    %c0_i32 = arith.constant 0 : i32
    %c0_i32_0 = arith.constant 0 : i32
    %c0_i32_1 = arith.constant 0 : i32
    return %c0_i32, %c0_i32_0 : i32, i32
  }
  func.func @transform_3(%arg0: i32) -> (i32, i32) {
    %c0_i32 = arith.constant 0 : i32
    %c0_i32_0 = arith.constant 0 : i32
    return %arg0, %c0_i32 : i32, i32
  }
}

module attributes {stable_mosaic.version = 11 : i64} {
  func.func @mlp_kernel(%arg0: i32, %arg1: memref<16x256xf32, #tpu.memory_space<vmem>>, %arg2: memref<256x128xbf16, #tpu.memory_space<vmem>>, %arg3: memref<1x128xf32, #tpu.memory_space<vmem>>, %arg4: memref<16x128xf32, #tpu.memory_space<vmem>>) attributes {dimension_semantics = [#tpu.dimension_semantics<parallel>], iteration_bounds = array<i64: 1>, scalar_prefetch = 0 : i64, scratch_operands = 0 : i64, tpu.core_type = #tpu.core_type<tc>, window_params = [{transform_indices = @transform_0, window_bounds = array<i64: 16, 256>}, {pipeline_mode = #tpu.pipeline_mode<synchronous>, transform_indices = @transform_1, window_bounds = array<i64: 256, 128>}, {pipeline_mode = #tpu.pipeline_mode<synchronous>, transform_indices = @transform_2, window_bounds = array<i64: 1, 128>}, {transform_indices = @transform_3, window_bounds = array<i64: 16, 128>}]} {
    %c0 = arith.constant 0 : index
    %c0_0 = arith.constant 0 : index
    %0 = vector.load %arg1[%c0, %c0_0] : memref<16x256xf32, #tpu.memory_space<vmem>>, vector<16x256xf32>
    %1 = arith.truncf %0 : vector<16x256xf32> to vector<16x256xbf16>
    %c0_1 = arith.constant 0 : index
    %c0_2 = arith.constant 0 : index
    %2 = vector.load %arg2[%c0_1, %c0_2] : memref<256x128xbf16, #tpu.memory_space<vmem>>, vector<256x128xbf16>
    %cst = arith.constant dense<0.000000e+00> : vector<16x128xf32>
    %3 = tpu.matmul %1, %2, %cst {dimension_numbers = #tpu.dot_dimension_numbers<[1], [0], [0], [1], [0, 0, 1, 1], [], []>} : vector<16x256xbf16>, vector<256x128xbf16>, vector<16x128xf32> -> vector<16x128xf32>
    %c0_3 = arith.constant 0 : index
    %c0_4 = arith.constant 0 : index
    %4 = vector.load %arg3[%c0_3, %c0_4] : memref<1x128xf32, #tpu.memory_space<vmem>>, vector<1x128xf32>
    %5 = vector.broadcast %4 : vector<1x128xf32> to vector<16x128xf32>
    %6 = arith.addf %3, %5 : vector<16x128xf32>
    %c0_5 = arith.constant 0 : index
    %c0_6 = arith.constant 0 : index
    %7 = vector.load %arg4[%c0_5, %c0_6] : memref<16x128xf32, #tpu.memory_space<vmem>>, vector<16x128xf32>
    tpu.vector_store %arg4[%c0_5, %c0_6], %6 {strides = array<i32>} : memref<16x128xf32, #tpu.memory_space<vmem>>, vector<16x128xf32>,
    return
  }
  func.func @transform_0(%arg0: i32) -> (i32, i32) {
    %c0_i32 = arith.constant 0 : i32
    %c0_i32_0 = arith.constant 0 : i32
    return %arg0, %c0_i32 : i32, i32
  }
  func.func @transform_1(%arg0: i32) -> (i32, i32) {
    %c0_i32 = arith.constant 0 : i32
    %c0_i32_0 = arith.constant 0 : i32
    %c0_i32_1 = arith.constant 0 : i32
    return %c0_i32, %c0_i32_0 : i32, i32
  }
  func.func @transform_2(%arg0: i32) -> (i32, i32) {
    %c0_i32 = arith.constant 0 : i32
    %c0_i32_0 = arith.constant 0 : i32
    %c0_i32_1 = arith.constant 0 : i32
    return %c0_i32, %c0_i32_0 : i32, i32
  }
  func.func @transform_3(%arg0: i32) -> (i32, i32) {
    %c0_i32 = arith.constant 0 : i32
    %c0_i32_0 = arith.constant 0 : i32
    return %arg0, %c0_i32 : i32, i32
  }
}

</mosaic_0001>

<bundles_post_ra>
// kernel: tpu_custom_call.1
= control target key start
LH: loop header
LB: loop body
LE: loop exit
PB: predicated region body
PF: predicated region fallthrough
CT: control target
= control target key end

     0   :  { %8 = vsyncpa [#allocation3], 0  ;;  %s444_s0 = inlined_call_operand.hbm [shape: f32[16,256], index: 0, kind: input, shape index: {}]   ;;  %s445_s1 = inlined_call_operand.hbm [shape: bf16[256,128], index: 1, kind: input, shape index: {}]   ;;  %s446_s2 = inlined_call_operand.vmem [shape: f32[1,128], index: 2, kind: input, shape index: {}]   ;;  %s447_s3 = inlined_call_operand.hbm [shape: f32[16,128], index: 3, kind: output, shape index: {}]  }
   0x1   :  { %9 = vsyncpa [#allocation6], 0 }
   0x2   :  { %10 = vsyncpa [#allocation4], 0  ;;  %s15_s14 = sshll.u32 %s444_s0, 4  ;;  %s403_s15 = smov [#allocation2]   ;;  %s16_s14 = int_to_ptr.hbm [resolvable:$true] %s15_s14 }
   0x3   :  { %s17_s16 = sshll.u32 %s403_s15, 4  ;;  %s28_s19 = sshll.u32 %s445_s1, 4  ;;  %s18_s16 = int_to_ptr.vmem [resolvable:$true] %s17_s16  ;;  %s29_s19 = int_to_ptr.hbm [resolvable:$true] %s28_s19 }
   0x4   :  { %s404_s20 = smov 256   ;;  %s405_s21 = smov 16  }
   0x5   :  { %23 = dma.hbm_to_vmem [thread:$0]  %s16_s14, 512, %s18_s16, [#allocation3], %s404_s20, %s404_s20, %s405_s21  }
   0x6   :  { %s406_s22 = smov [#allocation5]   ;;  %s407_s24 = smov 64  }
   0x7   :  { %s30_s23 = sshll.u32 %s406_s22, 4  ;;  %s408_s25 = smov 4   ;;  %s31_s23 = int_to_ptr.vmem [resolvable:$true] %s30_s23 }
   0x8   :  { %36 = dma.hbm_to_vmem [thread:$0]  %s29_s19, 2048, %s31_s23, [#allocation6], %s407_s24, %s407_s24, %s408_s25  }
   0x9   :  { %397 = dma.done.wait [#allocation3], 512  }
   0xa   :  { %398 = vsyncadd [#allocation3], 4294966784 }
   0xb   :  { %399 = dma.done.wait [#allocation6], 2048  }
   0xc   :  { %400 = vsyncadd [#allocation6], 4294965248  ;;  %v306_v0 = vld [vmem:[#allocation5 + $0x38] sm:$0xff]  ;;  %v305_v2 = vld [vmem:[#allocation5 + $0x30] sm:$0xff]  ;;  %s409_s26 = smov [#allocation7]   ;;  %s221_s30 = sshll.u32 %s447_s3, 4  ;;  %s222_s30 = int_to_ptr.hbm [resolvable:$true] %s221_s30 }
   0xd   :  { %v314_v1 = vld [vmem:[#allocation5 + $0x78] sm:$0xff]  ;;  %185 = vmatpush.bf16.msra.mxu0 %v306_v0  ;;  %v313_v3 = vld [vmem:[#allocation5 + $0x70] sm:$0xff]  ;;  %v304_v4 = vld [vmem:[#allocation5 + $0x28] sm:$0xff]  ;;  %s219_s27 = sshll.u32 %s409_s26, 4  ;;  %s410_s4 = smov 128   ;;  %s220_s27 = int_to_ptr.vmem [resolvable:$true] %s219_s27 }
   0xe   :  { %199 = vmatpush.bf16.msra.mxu1 %v314_v1  ;;  %v312_v5 = vld [vmem:[#allocation5 + $0x68] sm:$0xff]  ;;  %v303_v6 = vld [vmem:[#allocation5 + $0x20] sm:$0xff]  ;;  %v302_v8 = vld [vmem:[#allocation5 + $0x18] sm:$0xff] }
   0xf   :  { %v311_v7 = vld [vmem:[#allocation5 + $0x60] sm:$0xff]  ;;  %v310_v9 = vld [vmem:[#allocation5 + $0x58] sm:$0xff]  ;;  %v301_v10 = vld [vmem:[#allocation5 + $0x10] sm:$0xff] }
  0x10   :  { %v309_v11 = vld [vmem:[#allocation5 + $0x50] sm:$0xff]  ;;  %v300_v12 = vld [vmem:[#allocation5 + $0x8] sm:$0xff]  ;;  %v299_v14 = vld [vmem:[#allocation5] sm:$0xff] }
  0x11   :  { %186 = vmatpush.bf16.msra.mxu0 %v305_v2  ;;  %v308_v13 = vld [vmem:[#allocation5 + $0x48] sm:$0xff]  ;;  %v307_v15 = vld [vmem:[#allocation5 + $0x40] sm:$0xff]  ;;  %v49_v17 = vld [vmem:[#allocation2 + $0x10] sm:$0xff] }
  0x12   :  { %200 = vmatpush.bf16.msra.mxu1 %v313_v3  ;;  %v47_v16 = vld [vmem:[#allocation2] sm:$0xff]  ;;  %v48_v18 = vld [vmem:[#allocation2 + $0x8] sm:$0xff]  ;;  %v50_v19 = vld [vmem:[#allocation2 + $0x18] sm:$0xff] }
  0x13   :  { %v51_v20 = vpack.c.bf16 %v49_v17, %v47_v16  ;;  %v52_v21 = vpack.c.bf16 %v50_v19, %v48_v18  ;;  %v324_v22 = vld [vmem:[%s446_s2] ss:$0 sm:$0xff]  ;;  %s411_s2 = smov 8  }
  0x15   :  { %187 = vmatpush.bf16.msra.mxu0 %v304_v4 }
  0x16   :  { %201 = vmatpush.bf16.msra.mxu1 %v312_v5 }
  0x19   :  { %188 = vmatpush.bf16.msra.mxu0 %v303_v6 }
  0x1a   :  { %202 = vmatpush.bf16.msra.mxu1 %v311_v7 }
  0x1d   :  { %189 = vmatpush.bf16.msra.mxu0 %v302_v8 }
  0x1e   :  { %203 = vmatpush.bf16.msra.mxu1 %v310_v9 }
  0x21   :  { %190 = vmatpush.bf16.msra.mxu0 %v301_v10 }
  0x22   :  { %204 = vmatpush.bf16.msra.mxu1 %v309_v11 }
  0x25   :  { %191 = vmatpush.bf16.msra.mxu0 %v300_v12 }
  0x26   :  { %205 = vmatpush.bf16.msra.mxu1 %v308_v13 }
  0x29   :  { %192 = vmatpush.bf16.msra.mxu0 %v299_v14 }
  0x2a   :  { %206 = vmatpush.bf16.msra.mxu1 %v307_v15 }
  0x2c   :  { %193 = vmatmul.bf16.vlgmr.msra.gmra.mxu0 %v51_v20 }
  0x2d   :  { %207 = vmatmul.bf16.vlgmr.msra.gmra.mxu1 %v52_v21 }
  0xa9   :  { %v194_v23 = vpop.f32.mrf.mxu0 }
  0xaa   :  { %v208_v24 = vpop.f32.mrf.mxu1  ;;  %v195_v25 = vadd.f32 %v324_v22, %v194_v23 }
  0xac   :  { %v209_v26 = vadd.f32 %v208_v24, %v195_v25 }
  0xae   :  { %213 = vst [vmem:[#allocation7] sm:$0xff] %v209_v26 }
  0xb1   :  { %v196_v27 = vpop.f32.mrf.mxu0 }
  0xb2   :  { %v197_v28 = vadd.f32 %v324_v22, %v196_v27  ;;  %v210_v29 = vpop.f32.mrf.mxu1 }
  0xb4   :  { %v211_v30 = vadd.f32 %v210_v29, %v197_v28 }
  0xb6   :  { %214 = vst [vmem:[#allocation7 + $0x8] sm:$0xff] %v211_v30 }
  0xb7   :  { %227 = dma.vmem_to_hbm [thread:$0]  %s220_s27, 256, %s222_s30, [#allocation4], %s410_s4, %s410_s4, %s411_s2  }
  0xb8   :  { %401 = dma.done.wait [#allocation4], 256  }
  0xb9   :  { %402 = vsyncadd [#allocation4], 4294967040 }
  0xba   :  { %232 = vsyncpa [#allocation3], 1 }
  0xbb   :  { %233 = vsyncpa [#allocation6], 1 }
  0xbc   :  { %234 = vsyncpa [#allocation4], 1 }

// kernel: tpu_custom_call.1
= control target key start
LH: loop header
LB: loop body
LE: loop exit
PB: predicated region body
PF: predicated region fallthrough
CT: control target
= control target key end

     0   :  { %8 = vsyncpa [#allocation3], 0  ;;  %s444_s0 = inlined_call_operand.hbm [shape: f32[16,256], index: 0, kind: input, shape index: {}]   ;;  %s445_s1 = inlined_call_operand.hbm [shape: bf16[256,128], index: 1, kind: input, shape index: {}]   ;;  %s446_s2 = inlined_call_operand.vmem [shape: f32[1,128], index: 2, kind: input, shape index: {}]   ;;  %s447_s3 = inlined_call_operand.hbm [shape: f32[16,128], index: 3, kind: output, shape index: {}]  }
   0x1   :  { %9 = vsyncpa [#allocation6], 0 }
   0x2   :  { %10 = vsyncpa [#allocation4], 0  ;;  %s15_s14 = sshll.u32 %s444_s0, 4  ;;  %s403_s15 = smov [#allocation2]   ;;  %s16_s14 = int_to_ptr.hbm [resolvable:$true] %s15_s14 }
   0x3   :  { %s17_s16 = sshll.u32 %s403_s15, 4  ;;  %s28_s19 = sshll.u32 %s445_s1, 4  ;;  %s18_s16 = int_to_ptr.vmem [resolvable:$true] %s17_s16  ;;  %s29_s19 = int_to_ptr.hbm [resolvable:$true] %s28_s19 }
   0x4   :  { %s404_s20 = smov 256   ;;  %s405_s21 = smov 16  }
   0x5   :  { %23 = dma.hbm_to_vmem [thread:$0]  %s16_s14, 512, %s18_s16, [#allocation3], %s404_s20, %s404_s20, %s405_s21  }
   0x6   :  { %s406_s22 = smov [#allocation5]   ;;  %s407_s24 = smov 64  }
   0x7   :  { %s30_s23 = sshll.u32 %s406_s22, 4  ;;  %s408_s25 = smov 4   ;;  %s31_s23 = int_to_ptr.vmem [resolvable:$true] %s30_s23 }
   0x8   :  { %36 = dma.hbm_to_vmem [thread:$0]  %s29_s19, 2048, %s31_s23, [#allocation6], %s407_s24, %s407_s24, %s408_s25  }
   0x9   :  { %397 = dma.done.wait [#allocation3], 512  }
   0xa   :  { %398 = vsyncadd [#allocation3], 4294966784 }
   0xb   :  { %399 = dma.done.wait [#allocation6], 2048  }
   0xc   :  { %400 = vsyncadd [#allocation6], 4294965248  ;;  %v306_v0 = vld [vmem:[#allocation5 + $0x38] sm:$0xff]  ;;  %v305_v2 = vld [vmem:[#allocation5 + $0x30] sm:$0xff]  ;;  %s409_s26 = smov [#allocation7]   ;;  %s221_s30 = sshll.u32 %s447_s3, 4  ;;  %s222_s30 = int_to_ptr.hbm [resolvable:$true] %s221_s30 }
   0xd   :  { %v314_v1 = vld [vmem:[#allocation5 + $0x78] sm:$0xff]  ;;  %185 = vmatpush.bf16.msra.mxu0 %v306_v0  ;;  %v313_v3 = vld [vmem:[#allocation5 + $0x70] sm:$0xff]  ;;  %v304_v4 = vld [vmem:[#allocation5 + $0x28] sm:$0xff]  ;;  %s219_s27 = sshll.u32 %s409_s26, 4  ;;  %s410_s4 = smov 128   ;;  %s220_s27 = int_to_ptr.vmem [resolvable:$true] %s219_s27 }
   0xe   :  { %199 = vmatpush.bf16.msra.mxu1 %v314_v1  ;;  %v312_v5 = vld [vmem:[#allocation5 + $0x68] sm:$0xff]  ;;  %v303_v6 = vld [vmem:[#allocation5 + $0x20] sm:$0xff]  ;;  %v302_v8 = vld [vmem:[#allocation5 + $0x18] sm:$0xff] }
   0xf   :  { %v311_v7 = vld [vmem:[#allocation5 + $0x60] sm:$0xff]  ;;  %v310_v9 = vld [vmem:[#allocation5 + $0x58] sm:$0xff]  ;;  %v301_v10 = vld [vmem:[#allocation5 + $0x10] sm:$0xff] }
  0x10   :  { %v309_v11 = vld [vmem:[#allocation5 + $0x50] sm:$0xff]  ;;  %v300_v12 = vld [vmem:[#allocation5 + $0x8] sm:$0xff]  ;;  %v299_v14 = vld [vmem:[#allocation5] sm:$0xff] }
  0x11   :  { %186 = vmatpush.bf16.msra.mxu0 %v305_v2  ;;  %v308_v13 = vld [vmem:[#allocation5 + $0x48] sm:$0xff]  ;;  %v307_v15 = vld [vmem:[#allocation5 + $0x40] sm:$0xff]  ;;  %v49_v17 = vld [vmem:[#allocation2 + $0x10] sm:$0xff] }
  0x12   :  { %200 = vmatpush.bf16.msra.mxu1 %v313_v3  ;;  %v47_v16 = vld [vmem:[#allocation2] sm:$0xff]  ;;  %v48_v18 = vld [vmem:[#allocation2 + $0x8] sm:$0xff]  ;;  %v50_v19 = vld [vmem:[#allocation2 + $0x18] sm:$0xff] }
  0x13   :  { %v51_v20 = vpack.c.bf16 %v49_v17, %v47_v16  ;;  %v52_v21 = vpack.c.bf16 %v50_v19, %v48_v18  ;;  %v324_v22 = vld [vmem:[%s446_s2] ss:$0 sm:$0xff]  ;;  %s411_s2 = smov 8  }
  0x15   :  { %187 = vmatpush.bf16.msra.mxu0 %v304_v4 }
  0x16   :  { %201 = vmatpush.bf16.msra.mxu1 %v312_v5 }
  0x19   :  { %188 = vmatpush.bf16.msra.mxu0 %v303_v6 }
  0x1a   :  { %202 = vmatpush.bf16.msra.mxu1 %v311_v7 }
  0x1d   :  { %189 = vmatpush.bf16.msra.mxu0 %v302_v8 }
  0x1e   :  { %203 = vmatpush.bf16.msra.mxu1 %v310_v9 }
  0x21   :  { %190 = vmatpush.bf16.msra.mxu0 %v301_v10 }
  0x22   :  { %204 = vmatpush.bf16.msra.mxu1 %v309_v11 }
  0x25   :  { %191 = vmatpush.bf16.msra.mxu0 %v300_v12 }
  0x26   :  { %205 = vmatpush.bf16.msra.mxu1 %v308_v13 }
  0x29   :  { %192 = vmatpush.bf16.msra.mxu0 %v299_v14 }
  0x2a   :  { %206 = vmatpush.bf16.msra.mxu1 %v307_v15 }
  0x2c   :  { %193 = vmatmul.bf16.vlgmr.msra.gmra.mxu0 %v51_v20 }
  0x2d   :  { %207 = vmatmul.bf16.vlgmr.msra.gmra.mxu1 %v52_v21 }
  0xa9   :  { %v194_v23 = vpop.f32.mrf.mxu0 }
  0xaa   :  { %v208_v24 = vpop.f32.mrf.mxu1  ;;  %v195_v25 = vadd.f32 %v324_v22, %v194_v23 }
  0xac   :  { %v209_v26 = vadd.f32 %v208_v24, %v195_v25 }
  0xae   :  { %213 = vst [vmem:[#allocation7] sm:$0xff] %v209_v26 }
  0xb1   :  { %v196_v27 = vpop.f32.mrf.mxu0 }
  0xb2   :  { %v197_v28 = vadd.f32 %v324_v22, %v196_v27  ;;  %v210_v29 = vpop.f32.mrf.mxu1 }
  0xb4   :  { %v211_v30 = vadd.f32 %v210_v29, %v197_v28 }
  0xb6   :  { %214 = vst [vmem:[#allocation7 + $0x8] sm:$0xff] %v211_v30 }
  0xb7   :  { %227 = dma.vmem_to_hbm [thread:$0]  %s220_s27, 256, %s222_s30, [#allocation4], %s410_s4, %s410_s4, %s411_s2  }
  0xb8   :  { %401 = dma.done.wait [#allocation4], 256  }
  0xb9   :  { %402 = vsyncadd [#allocation4], 4294967040 }
  0xba   :  { %232 = vsyncpa [#allocation3], 1 }
  0xbb   :  { %233 = vsyncpa [#allocation6], 1 }
  0xbc   :  { %234 = vsyncpa [#allocation4], 1 }

</bundles_post_ra>
